<compile_context>
chip_gen: v6e
topology: v6e:2x2x1
jax: 0.10.0
libtpu: 0.0.40
codegen_flags: <defaults>
</compile_context>

<pallas_src>
import functools
import math

import jax
import jax.numpy as jnp
from jax import lax
from jax.experimental import pallas as pl
from jax.experimental.pallas import tpu as pltpu


def mha_kernel(q_ref, k_ref, v_ref, wq_ref, wk_ref, wv_ref, wo_ref, b_ref,
               o_ref, q_sc, k_sc, v_sc, ctx_sc, *, num_heads, head_dim):
    """One (batch, q-tile) step: fused projections + per-head attention + single out-proj."""
    qt = pl.program_id(1)

    # Full-width K/V projections once per batch (reused across all q-tiles of this batch).
    @pl.when(qt == 0)
    def _():
        k_sc[...] = jnp.dot(k_ref[0], wk_ref[...],
                            preferred_element_type=jnp.float32).astype(k_sc.dtype)
        v_sc[...] = jnp.dot(v_ref[0], wv_ref[...],
                            preferred_element_type=jnp.float32).astype(v_sc.dtype)

    # Full-width Q projection for this query tile (softmax scale pre-folded into wq).
    q_sc[...] = jnp.dot(q_ref[0], wq_ref[...],
                        preferred_element_type=jnp.float32).astype(q_sc.dtype)

    # Per-head attention; each head writes its context slice into the (Tq, E) ctx scratch.
    for h in range(num_heads):
        lo = h * head_dim
        hi = lo + head_dim
        q_h = q_sc[:, lo:hi]                                   # (Tq, Dh) bf16
        k_h = k_sc[:, lo:hi]                                   # (S,  Dh) bf16
        v_h = v_sc[:, lo:hi]                                   # (S,  Dh) bf16

        # scores = q_h @ k_h^T without materializing a transpose (contract head_dim axes).
        s = lax.dot_general(q_h, k_h, (((1,), (1,)), ((), ())),
                            preferred_element_type=jnp.float32)   # (Tq, S)

        # Softmax over keys (f32 on VPU/EUP; reciprocal goes to the EUP slot).
        m = jnp.max(s, axis=-1, keepdims=True)
        p = jnp.exp(s - m)
        denom = jnp.sum(p, axis=-1, keepdims=True)
        p = p * pl.reciprocal(denom, approx=True)

        ctx_h = jnp.dot(p.astype(jnp.bfloat16), v_h,
                        preferred_element_type=jnp.float32)       # (Tq, Dh)
        ctx_sc[:, lo:hi] = ctx_h.astype(ctx_sc.dtype)

    # Single full-width out-projection + bias for this tile.
    out = jnp.dot(ctx_sc[...], wo_ref[...], preferred_element_type=jnp.float32)
    out = out + b_ref[...].astype(jnp.float32)
    o_ref[0] = out.astype(o_ref.dtype)


def _pick_q_tile(seq_len, max_tile=512):
    """Largest query tile <= max_tile that evenly divides seq_len (full seq if it fits)."""
    if seq_len <= max_tile:
        return seq_len
    for t in range(max_tile, 7, -8):
        if seq_len % t == 0:
            return t
    return seq_len


def tensor_core_mha(query, key, value, wq, wk, wv, wo, bo, *, num_heads, q_tile=None):
    """query/key/value: (B, S, E) fp16; w*: (E, E) fp16 (PyTorch [out, in]); bo: (E,) fp16."""
    B, S, E = query.shape
    H = num_heads
    assert E % H == 0, "embed_dim must be divisible by num_heads"
    Dh = E // H
    scale = 1.0 / math.sqrt(Dh)

    Tq = _pick_q_tile(S) if q_tile is None else q_tile
    assert S % Tq == 0, "query tile must evenly divide the sequence length"
    QT = S // Tq

    # One fp16 -> bf16 cast at the boundary (native MXU dtype, half the f32 traffic).
    q_in = query.astype(jnp.bfloat16)
    k_in = key.astype(jnp.bfloat16)
    v_in = value.astype(jnp.bfloat16)

    # One-time weight transforms: PyTorch Linear weight is (out, in); x @ W^T uses W^T (E, E).
    # The 1/sqrt(Dh) softmax scale is folded into Wq (constant weight transform, not per-call).
    wq_t = (wq.astype(jnp.float32).T * scale).astype(jnp.bfloat16)
    wk_t = wk.T.astype(jnp.bfloat16)
    wv_t = wv.T.astype(jnp.bfloat16)
    wo_t = wo.T.astype(jnp.bfloat16)
    bo_b = bo.reshape(1, E).astype(jnp.bfloat16)

    # Explicit VMEM budget: double-buffered inputs/outputs + resident scratch + score headroom.
    bpe = 2  # bf16 bytes
    act_in = 2 * (Tq * E + 2 * S * E) * bpe        # q tile, full-seq k, v (x2 pipeline buffers)
    w_in = 2 * (4 * E * E + E) * bpe               # 4 weights + bias (x2 pipeline buffers)
    out_b = 2 * Tq * E * bpe                       # output tile (x2 pipeline buffers)
    scratch = (2 * Tq * E + 2 * S * E) * bpe       # q_sc + ctx_sc + k_sc + v_sc
    interm = 3 * Tq * S * 4                        # f32 score/prob spill headroom per head
    vmem_limit = min(max(act_in + w_in + out_b + scratch + interm + (4 << 20), 32 << 20),
                     128 << 20)

    # Advisory cost estimate so XLA schedules the boundary casts around the custom call.
    flops = int(8 * B * S * E * E + 4 * B * S * S * E)
    transcendentals = int(B * H * S * S)
    bytes_accessed = int(bpe * (4 * B * S * E + 4 * E * E + E))
    cost = pl.CostEstimate(flops=flops, transcendentals=transcendentals,
                           bytes_accessed=bytes_accessed)

    out_bf16 = pl.pallas_call(
        functools.partial(mha_kernel, num_heads=H, head_dim=Dh),
        out_shape=jax.ShapeDtypeStruct((B, S, E), jnp.bfloat16),
        grid_spec=pltpu.PrefetchScalarGridSpec(
            num_scalar_prefetch=0,
            grid=(B, QT),
            in_specs=[
                pl.BlockSpec((1, Tq, E), lambda b, t: (b, t, 0)),   # query tile
                pl.BlockSpec((1, S, E), lambda b, t: (b, 0, 0)),    # key (full seq, qt-invariant)
                pl.BlockSpec((1, S, E), lambda b, t: (b, 0, 0)),    # value (full seq, qt-invariant)
                pl.BlockSpec((E, E), lambda b, t: (0, 0)),          # Wq^T * scale
                pl.BlockSpec((E, E), lambda b, t: (0, 0)),          # Wk^T
                pl.BlockSpec((E, E), lambda b, t: (0, 0)),          # Wv^T
                pl.BlockSpec((E, E), lambda b, t: (0, 0)),          # Wo^T
                pl.BlockSpec((1, E), lambda b, t: (0, 0)),          # out_proj bias
            ],
            out_specs=pl.BlockSpec((1, Tq, E), lambda b, t: (b, t, 0)),
            scratch_shapes=[
                pltpu.VMEM((Tq, E), jnp.bfloat16),   # projected Q (this tile)
                pltpu.VMEM((S, E), jnp.bfloat16),    # projected K (full seq, per batch)
                pltpu.VMEM((S, E), jnp.bfloat16),    # projected V (full seq, per batch)
                pltpu.VMEM((Tq, E), jnp.bfloat16),   # per-head context concat (this tile)
            ],
        ),
        compiler_params=pltpu.CompilerParams(
            dimension_semantics=("parallel", "arbitrary"),
            vmem_limit_bytes=int(vmem_limit),
        ),
        cost_estimate=cost,
    )(q_in, k_in, v_in, wq_t, wk_t, wv_t, wo_t, bo_b)

    # Single cast for dtype parity with the PyTorch module (fp16 output).
    return out_bf16.astype(jnp.float16)


def init_params(key, embed_dim):
    """Mirror nn.init.kaiming_uniform_(a=sqrt(5)) and the out_proj bias init."""
    kq, kk, kv, ko, kb = jax.random.split(key, 5)
    bound = 1.0 / math.sqrt(embed_dim)   # kaiming_uniform(a=sqrt(5)) -> 1/sqrt(fan_in)

    def lin_w(k):
        return jax.random.uniform(k, (embed_dim, embed_dim), jnp.float32,
                                  -bound, bound).astype(jnp.float16)

    wq, wk, wv, wo = lin_w(kq), lin_w(kk), lin_w(kv), lin_w(ko)
    bo = jax.random.uniform(kb, (embed_dim,), jnp.float32, -bound, bound).astype(jnp.float16)
    return wq, wk, wv, wo, bo


def mha_reference(query, key, value, wq, wk, wv, wo, bo, *, num_heads):
    """Plain-JAX reference (f32) of the module's forward math."""
    B, S, E = query.shape
    H = num_heads
    Dh = E // H
    scale = 1.0 / math.sqrt(Dh)
    f32 = jnp.float32
    q = query.astype(f32) @ wq.astype(f32).T
    k = key.astype(f32) @ wk.astype(f32).T
    v = value.astype(f32) @ wv.astype(f32).T
    q = q.reshape(B, S, H, Dh).transpose(0, 2, 1, 3)
    k = k.reshape(B, S, H, Dh).transpose(0, 2, 1, 3)
    v = v.reshape(B, S, H, Dh).transpose(0, 2, 1, 3)
    s = jnp.einsum("bhqd,bhkd->bhqk", q, k) * scale
    p = jax.nn.softmax(s, axis=-1)
    ctx = jnp.einsum("bhqk,bhkd->bhqd", p, v)
    ctx = ctx.transpose(0, 2, 1, 3).reshape(B, S, E)
    return ctx @ wo.astype(f32).T + bo.astype(f32)


if __name__ == "__main__":
    batch, seq, embed_dim, num_heads = 2, 8, 32, 4

    root = jax.random.PRNGKey(0)
    kq, kk, kv, kp = jax.random.split(root, 4)
    query = jax.random.normal(kq, (batch, seq, embed_dim), jnp.float32).astype(jnp.float16)
    key_in = jax.random.normal(kk, (batch, seq, embed_dim), jnp.float32).astype(jnp.float16)
    value = jax.random.normal(kv, (batch, seq, embed_dim), jnp.float32).astype(jnp.float16)
    wq, wk, wv, wo, bo = init_params(kp, embed_dim)

    out = tensor_core_mha(query, key_in, value, wq, wk, wv, wo, bo, num_heads=num_heads)
    out = jax.block_until_ready(out)

    assert out.shape == (batch, seq, embed_dim) and out.dtype == jnp.float16

    ref = mha_reference(query, key_in, value, wq, wk, wv, wo, bo, num_heads=num_heads)
    assert jnp.allclose(out.astype(jnp.float32), ref, atol=3e-2, rtol=3e-2)

    print("KERNEL_OK")
</pallas_src>

<mosaic_0001>
module attributes {stable_mosaic.version = 11 : i64} {
  func.func @mha_kernel(%arg0: i32, %arg1: i32, %arg2: memref<1x8x32xbf16, #tpu.memory_space<vmem>>, %arg3: memref<1x8x32xbf16, #tpu.memory_space<vmem>>, %arg4: memref<1x8x32xbf16, #tpu.memory_space<vmem>>, %arg5: memref<32x32xbf16, #tpu.memory_space<vmem>>, %arg6: memref<32x32xbf16, #tpu.memory_space<vmem>>, %arg7: memref<32x32xbf16, #tpu.memory_space<vmem>>, %arg8: memref<32x32xbf16, #tpu.memory_space<vmem>>, %arg9: memref<1x32xbf16, #tpu.memory_space<vmem>>, %arg10: memref<1x8x32xbf16, #tpu.memory_space<vmem>>, %arg11: memref<8x32xbf16, #tpu.memory_space<vmem>>, %arg12: memref<8x32xbf16, #tpu.memory_space<vmem>>, %arg13: memref<8x32xbf16, #tpu.memory_space<vmem>>, %arg14: memref<8x32xbf16, #tpu.memory_space<vmem>>) attributes {dimension_semantics = [#tpu.dimension_semantics<parallel>, #tpu.dimension_semantics<arbitrary>], iteration_bounds = array<i64: 2, 1>, scalar_prefetch = 0 : i64, scratch_operands = 4 : i64, tpu.core_type = #tpu.core_type<tc>, window_params = [{transform_indices = @transform_0, window_bounds = array<i64: 1, 8, 32>}, {transform_indices = @transform_1, window_bounds = array<i64: 1, 8, 32>}, {transform_indices = @transform_2, window_bounds = array<i64: 1, 8, 32>}, {pipeline_mode = #tpu.pipeline_mode<synchronous>, transform_indices = @transform_3, window_bounds = array<i64: 32, 32>}, {pipeline_mode = #tpu.pipeline_mode<synchronous>, transform_indices = @transform_4, window_bounds = array<i64: 32, 32>}, {pipeline_mode = #tpu.pipeline_mode<synchronous>, transform_indices = @transform_5, window_bounds = array<i64: 32, 32>}, {pipeline_mode = #tpu.pipeline_mode<synchronous>, transform_indices = @transform_6, window_bounds = array<i64: 32, 32>}, {pipeline_mode = #tpu.pipeline_mode<synchronous>, transform_indices = @transform_7, window_bounds = array<i64: 1, 32>}, {transform_indices = @transform_8, window_bounds = array<i64: 1, 8, 32>}]} {
    %c0_i32 = arith.constant 0 : i32
    %0 = arith.cmpi eq, %arg1, %c0_i32 : i32
    %1 = arith.extui %0 : i1 to i32
    %c0_i32_0 = arith.constant 0 : i32
    %2 = arith.cmpi ne, %1, %c0_i32_0 : i32
    scf.if %2 {
      %c0_62 = arith.constant 0 : index
      %c0_63 = arith.constant 0 : index
      %c0_64 = arith.constant 0 : index
      %92 = vector.load %arg3[%c0_62, %c0_63, %c0_64] : memref<1x8x32xbf16, #tpu.memory_space<vmem>>, vector<1x8x32xbf16>
      %93 = vector.shape_cast %92 : vector<1x8x32xbf16> to vector<8x32xbf16>
      %c0_65 = arith.constant 0 : index
      %c0_66 = arith.constant 0 : index
      %94 = vector.load %arg6[%c0_65, %c0_66] : memref<32x32xbf16, #tpu.memory_space<vmem>>, vector<32x32xbf16>
      %cst_67 = arith.constant dense<0.000000e+00> : vector<8x32xf32>
      %95 = tpu.matmul %93, %94, %cst_67 {dimension_numbers = #tpu.dot_dimension_numbers<[1], [0], [0], [1], [0, 0, 1, 1], [], []>} : vector<8x32xbf16>, vector<32x32xbf16>, vector<8x32xf32> -> vector<8x32xf32>
      %96 = arith.truncf %95 : vector<8x32xf32> to vector<8x32xbf16>
      %c0_68 = arith.constant 0 : index
      %c0_69 = arith.constant 0 : index
      %97 = vector.load %arg12[%c0_68, %c0_69] : memref<8x32xbf16, #tpu.memory_space<vmem>>, vector<8x32xbf16>
      tpu.vector_store %arg12[%c0_68, %c0_69], %96 {strides = array<i32>} : memref<8x32xbf16, #tpu.memory_space<vmem>>, vector<8x32xbf16>,
      %c0_70 = arith.constant 0 : index
      %c0_71 = arith.constant 0 : index
      %c0_72 = arith.constant 0 : index
      %98 = vector.load %arg4[%c0_70, %c0_71, %c0_72] : memref<1x8x32xbf16, #tpu.memory_space<vmem>>, vector<1x8x32xbf16>
      %99 = vector.shape_cast %98 : vector<1x8x32xbf16> to vector<8x32xbf16>
      %c0_73 = arith.constant 0 : index
      %c0_74 = arith.constant 0 : index
      %100 = vector.load %arg7[%c0_73, %c0_74] : memref<32x32xbf16, #tpu.memory_space<vmem>>, vector<32x32xbf16>
      %cst_75 = arith.constant dense<0.000000e+00> : vector<8x32xf32>
      %101 = tpu.matmul %99, %100, %cst_75 {dimension_numbers = #tpu.dot_dimension_numbers<[1], [0], [0], [1], [0, 0, 1, 1], [], []>} : vector<8x32xbf16>, vector<32x32xbf16>, vector<8x32xf32> -> vector<8x32xf32>
      %102 = arith.truncf %101 : vector<8x32xf32> to vector<8x32xbf16>
      %c0_76 = arith.constant 0 : index
      %c0_77 = arith.constant 0 : index
      %103 = vector.load %arg13[%c0_76, %c0_77] : memref<8x32xbf16, #tpu.memory_space<vmem>>, vector<8x32xbf16>
      tpu.vector_store %arg13[%c0_76, %c0_77], %102 {strides = array<i32>} : memref<8x32xbf16, #tpu.memory_space<vmem>>, vector<8x32xbf16>,
    } else {
    }
    %c0 = arith.constant 0 : index
    %c0_1 = arith.constant 0 : index
    %c0_2 = arith.constant 0 : index
    %3 = vector.load %arg2[%c0, %c0_1, %c0_2] : memref<1x8x32xbf16, #tpu.memory_space<vmem>>, vector<1x8x32xbf16>
    %4 = vector.shape_cast %3 : vector<1x8x32xbf16> to vector<8x32xbf16>
    %c0_3 = arith.constant 0 : index
    %c0_4 = arith.constant 0 : index
    %5 = vector.load %arg5[%c0_3, %c0_4] : memref<32x32xbf16, #tpu.memory_space<vmem>>, vector<32x32xbf16>
    %cst = arith.constant dense<0.000000e+00> : vector<8x32xf32>
    %6 = tpu.matmul %4, %5, %cst {dimension_numbers = #tpu.dot_dimension_numbers<[1], [0], [0], [1], [0, 0, 1, 1], [], []>} : vector<8x32xbf16>, vector<32x32xbf16>, vector<8x32xf32> -> vector<8x32xf32>
    %7 = arith.truncf %6 : vector<8x32xf32> to vector<8x32xbf16>
    %c0_5 = arith.constant 0 : index
    %c0_6 = arith.constant 0 : index
    %8 = vector.load %arg11[%c0_5, %c0_6] : memref<8x32xbf16, #tpu.memory_space<vmem>>, vector<8x32xbf16>
    tpu.vector_store %arg11[%c0_5, %c0_6], %7 {strides = array<i32>} : memref<8x32xbf16, #tpu.memory_space<vmem>>, vector<8x32xbf16>,
    %c0_7 = arith.constant 0 : index
    %c0_8 = arith.constant 0 : index
    %9 = vector.load %arg11[%c0_7, %c0_8] : memref<8x32xbf16, #tpu.memory_space<vmem>>, vector<8x8xbf16>
    %c0_9 = arith.constant 0 : index
    %c0_10 = arith.constant 0 : index
    %10 = vector.load %arg12[%c0_9, %c0_10] : memref<8x32xbf16, #tpu.memory_space<vmem>>, vector<8x8xbf16>
    %c0_11 = arith.constant 0 : index
    %c0_12 = arith.constant 0 : index
    %11 = vector.load %arg13[%c0_11, %c0_12] : memref<8x32xbf16, #tpu.memory_space<vmem>>, vector<8x8xbf16>
    %cst_13 = arith.constant dense<0.000000e+00> : vector<8x8xf32>
    %12 = tpu.matmul %9, %10, %cst_13 {dimension_numbers = #tpu.dot_dimension_numbers<[1], [1], [0], [0], [0, 0, 1, 0], [], []>} : vector<8x8xbf16>, vector<8x8xbf16>, vector<8x8xf32> -> vector<8x8xf32>
    %cst_14 = arith.constant dense<0xFF800000> : vector<8xf32>
    %13 = vector.multi_reduction <maximumf>, %12, %cst_14 [1] : vector<8x8xf32> to vector<8xf32>
    %14 = vector.shape_cast %13 : vector<8xf32> to vector<8x1xf32>
    %15 = vector.broadcast %14 : vector<8x1xf32> to vector<8x8xf32>
    %16 = arith.subf %12, %15 : vector<8x8xf32>
    %17 = math.exp %16 : vector<8x8xf32>
    %cst_15 = arith.constant dense<0.000000e+00> : vector<8xf32>
    %18 = vector.multi_reduction <add>, %17, %cst_15 [1] : vector<8x8xf32> to vector<8xf32>
    %19 = vector.shape_cast %18 : vector<8xf32> to vector<8x1xf32>
    %20 = tpu.reciprocal %19 {approx = true} : vector<8x1xf32> -> vector<8x1xf32>
    %21 = vector.broadcast %20 : vector<8x1xf32> to vector<8x8xf32>
    %22 = arith.mulf %17, %21 : vector<8x8xf32>
    %23 = arith.truncf %22 : vector<8x8xf32> to vector<8x8xbf16>
    %cst_16 = arith.constant dense<0.000000e+00> : vector<8x8xf32>
    %24 = tpu.matmul %23, %11, %cst_16 {dimension_numbers = #tpu.dot_dimension_numbers<[1], [0], [0], [1], [0, 0, 1, 1], [], []>} : vector<8x8xbf16>, vector<8x8xbf16>, vector<8x8xf32> -> vector<8x8xf32>
    %25 = arith.truncf %24 : vector<8x8xf32> to vector<8x8xbf16>
    %c0_17 = arith.constant 0 : index
    %c0_18 = arith.constant 0 : index
    %26 = vector.load %arg14[%c0_17, %c0_18] : memref<8x32xbf16, #tpu.memory_space<vmem>>, vector<8x8xbf16>
    tpu.vector_store %arg14[%c0_17, %c0_18], %25 {strides = array<i32>} : memref<8x32xbf16, #tpu.memory_space<vmem>>, vector<8x8xbf16>,
    %c0_19 = arith.constant 0 : index
    %c8 = arith.constant 8 : index
    %27 = vector.load %arg11[%c0_19, %c8] : memref<8x32xbf16, #tpu.memory_space<vmem>>, vector<8x8xbf16>
    %c0_20 = arith.constant 0 : index
    %c8_21 = arith.constant 8 : index
    %28 = vector.load %arg12[%c0_20, %c8_21] : memref<8x32xbf16, #tpu.memory_space<vmem>>, vector<8x8xbf16>
    %c0_22 = arith.constant 0 : index
    %c8_23 = arith.constant 8 : index
    %29 = vector.load %arg13[%c0_22, %c8_23] : memref<8x32xbf16, #tpu.memory_space<vmem>>, vector<8x8xbf16>
    %cst_24 = arith.constant dense<0.000000e+00> : vector<8x8xf32>
    %30 = tpu.matmul %27, %28, %cst_24 {dimension_numbers = #tpu.dot_dimension_numbers<[1], [1], [0], [0], [0, 0, 1, 0], [], []>} : vector<8x8xbf16>, vector<8x8xbf16>, vector<8x8xf32> -> vector<8x8xf32>
    %cst_25 = arith.constant dense<0xFF800000> : vector<8xf32>
    %31 = vector.multi_reduction <maximumf>, %30, %cst_25 [1] : vector<8x8xf32> to vector<8xf32>
    %32 = vector.shape_cast %31 : vector<8xf32> to vector<8x1xf32>
    %33 = vector.broadcast %32 : vector<8x1xf32> to vector<8x8xf32>
    %34 = arith.subf %30, %33 : vector<8x8xf32>
    %35 = math.exp %34 : vector<8x8xf32>
    %cst_26 = arith.constant dense<0.000000e+00> : vector<8xf32>
    %36 = vector.multi_reduction <add>, %35, %cst_26 [1] : vector<8x8xf32> to vector<8xf32>
    %37 = vector.shape_cast %36 : vector<8xf32> to vector<8x1xf32>
    %38 = tpu.reciprocal %37 {approx = true} : vector<8x1xf32> -> vector<8x1xf32>
    %39 = vector.broadcast %38 : vector<8x1xf32> to vector<8x8xf32>
    %40 = arith.mulf %35, %39 : vector<8x8xf32>
    %41 = arith.truncf %40 : vector<8x8xf32> to vector<8x8xbf16>
    %cst_27 = arith.constant dense<0.000000e+00> : vector<8x8xf32>
    %42 = tpu.matmul %41, %29, %cst_27 {dimension_numbers = #tpu.dot_dimension_numbers<[1], [0], [0], [1], [0, 0, 1, 1], [], []>} : vector<8x8xbf16>, vector<8x8xbf16>, vector<8x8xf32> -> vector<8x8xf32>
    %43 = arith.truncf %42 : vector<8x8xf32> to vector<8x8xbf16>
    %c0_28 = arith.constant 0 : index
    %c8_29 = arith.constant 8 : index
    %44 = vector.load %arg14[%c0_28, %c8_29] : memref<8x32xbf16, #tpu.memory_space<vmem>>, vector<8x8xbf16>
    tpu.vector_store %arg14[%c0_28, %c8_29], %43 {strides = array<i32>} : memref<8x32xbf16, #tpu.memory_space<vmem>>, vector<8x8xbf16>,
    %c0_30 = arith.constant 0 : index
    %c16 = arith.constant 16 : index
    %45 = vector.load %arg11[%c0_30, %c16] : memref<8x32xbf16, #tpu.memory_space<vmem>>, vector<8x8xbf16>
    %c0_31 = arith.constant 0 : index
    %c16_32 = arith.constant 16 : index
    %46 = vector.load %arg12[%c0_31, %c16_32] : memref<8x32xbf16, #tpu.memory_space<vmem>>, vector<8x8xbf16>
    %c0_33 = arith.constant 0 : index
    %c16_34 = arith.constant 16 : index
    %47 = vector.load %arg13[%c0_33, %c16_34] : memref<8x32xbf16, #tpu.memory_space<vmem>>, vector<8x8xbf16>
    %cst_35 = arith.constant dense<0.000000e+00> : vector<8x8xf32>
    %48 = tpu.matmul %45, %46, %cst_35 {dimension_numbers = #tpu.dot_dimension_numbers<[1], [1], [0], [0], [0, 0, 1, 0], [], []>} : vector<8x8xbf16>, vector<8x8xbf16>, vector<8x8xf32> -> vector<8x8xf32>
    %cst_36 = arith.constant dense<0xFF800000> : vector<8xf32>
    %49 = vector.multi_reduction <maximumf>, %48, %cst_36 [1] : vector<8x8xf32> to vector<8xf32>
    %50 = vector.shape_cast %49 : vector<8xf32> to vector<8x1xf32>
    %51 = vector.broadcast %50 : vector<8x1xf32> to vector<8x8xf32>
    %52 = arith.subf %48, %51 : vector<8x8xf32>
    %53 = math.exp %52 : vector<8x8xf32>
    %cst_37 = arith.constant dense<0.000000e+00> : vector<8xf32>
    %54 = vector.multi_reduction <add>, %53, %cst_37 [1] : vector<8x8xf32> to vector<8xf32>
    %55 = vector.shape_cast %54 : vector<8xf32> to vector<8x1xf32>
    %56 = tpu.reciprocal %55 {approx = true} : vector<8x1xf32> -> vector<8x1xf32>
    %57 = vector.broadcast %56 : vector<8x1xf32> to vector<8x8xf32>
    %58 = arith.mulf %53, %57 : vector<8x8xf32>
    %59 = arith.truncf %58 : vector<8x8xf32> to vector<8x8xbf16>
    %cst_38 = arith.constant dense<0.000000e+00> : vector<8x8xf32>
    %60 = tpu.matmul %59, %47, %cst_38 {dimension_numbers = #tpu.dot_dimension_numbers<[1], [0], [0], [1], [0, 0, 1, 1], [], []>} : vector<8x8xbf16>, vector<8x8xbf16>, vector<8x8xf32> -> vector<8x8xf32>
    %61 = arith.truncf %60 : vector<8x8xf32> to vector<8x8xbf16>
    %c0_39 = arith.constant 0 : index
    %c16_40 = arith.constant 16 : index
    %62 = vector.load %arg14[%c0_39, %c16_40] : memref<8x32xbf16, #tpu.memory_space<vmem>>, vector<8x8xbf16>
    tpu.vector_store %arg14[%c0_39, %c16_40], %61 {strides = array<i32>} : memref<8x32xbf16, #tpu.memory_space<vmem>>, vector<8x8xbf16>,
    %c0_41 = arith.constant 0 : index
    %c24 = arith.constant 24 : index
    %63 = vector.load %arg11[%c0_41, %c24] : memref<8x32xbf16, #tpu.memory_space<vmem>>, vector<8x8xbf16>
    %c0_42 = arith.constant 0 : index
    %c24_43 = arith.constant 24 : index
    %64 = vector.load %arg12[%c0_42, %c24_43] : memref<8x32xbf16, #tpu.memory_space<vmem>>, vector<8x8xbf16>
    %c0_44 = arith.constant 0 : index
    %c24_45 = arith.constant 24 : index
    %65 = vector.load %arg13[%c0_44, %c24_45] : memref<8x32xbf16, #tpu.memory_space<vmem>>, vector<8x8xbf16>
    %cst_46 = arith.constant dense<0.000000e+00> : vector<8x8xf32>
    %66 = tpu.matmul %63, %64, %cst_46 {dimension_numbers = #tpu.dot_dimension_numbers<[1], [1], [0], [0], [0, 0, 1, 0], [], []>} : vector<8x8xbf16>, vector<8x8xbf16>, vector<8x8xf32> -> vector<8x8xf32>
    %cst_47 = arith.constant dense<0xFF800000> : vector<8xf32>
    %67 = vector.multi_reduction <maximumf>, %66, %cst_47 [1] : vector<8x8xf32> to vector<8xf32>
    %68 = vector.shape_cast %67 : vector<8xf32> to vector<8x1xf32>
    %69 = vector.broadcast %68 : vector<8x1xf32> to vector<8x8xf32>
    %70 = arith.subf %66, %69 : vector<8x8xf32>
    %71 = math.exp %70 : vector<8x8xf32>
    %cst_48 = arith.constant dense<0.000000e+00> : vector<8xf32>
    %72 = vector.multi_reduction <add>, %71, %cst_48 [1] : vector<8x8xf32> to vector<8xf32>
    %73 = vector.shape_cast %72 : vector<8xf32> to vector<8x1xf32>
    %74 = tpu.reciprocal %73 {approx = true} : vector<8x1xf32> -> vector<8x1xf32>
    %75 = vector.broadcast %74 : vector<8x1xf32> to vector<8x8xf32>
    %76 = arith.mulf %71, %75 : vector<8x8xf32>
    %77 = arith.truncf %76 : vector<8x8xf32> to vector<8x8xbf16>
    %cst_49 = arith.constant dense<0.000000e+00> : vector<8x8xf32>
    %78 = tpu.matmul %77, %65, %cst_49 {dimension_numbers = #tpu.dot_dimension_numbers<[1], [0], [0], [1], [0, 0, 1, 1], [], []>} : vector<8x8xbf16>, vector<8x8xbf16>, vector<8x8xf32> -> vector<8x8xf32>
    %79 = arith.truncf %78 : vector<8x8xf32> to vector<8x8xbf16>
    %c0_50 = arith.constant 0 : index
    %c24_51 = arith.constant 24 : index
    %80 = vector.load %arg14[%c0_50, %c24_51] : memref<8x32xbf16, #tpu.memory_space<vmem>>, vector<8x8xbf16>
    tpu.vector_store %arg14[%c0_50, %c24_51], %79 {strides = array<i32>} : memref<8x32xbf16, #tpu.memory_space<vmem>>, vector<8x8xbf16>,
    %c0_52 = arith.constant 0 : index
    %c0_53 = arith.constant 0 : index
    %81 = vector.load %arg14[%c0_52, %c0_53] : memref<8x32xbf16, #tpu.memory_space<vmem>>, vector<8x32xbf16>
    %c0_54 = arith.constant 0 : index
    %c0_55 = arith.constant 0 : index
    %82 = vector.load %arg8[%c0_54, %c0_55] : memref<32x32xbf16, #tpu.memory_space<vmem>>, vector<32x32xbf16>
    %cst_56 = arith.constant dense<0.000000e+00> : vector<8x32xf32>
    %83 = tpu.matmul %81, %82, %cst_56 {dimension_numbers = #tpu.dot_dimension_numbers<[1], [0], [0], [1], [0, 0, 1, 1], [], []>} : vector<8x32xbf16>, vector<32x32xbf16>, vector<8x32xf32> -> vector<8x32xf32>
    %c0_57 = arith.constant 0 : index
    %c0_58 = arith.constant 0 : index
    %84 = vector.load %arg9[%c0_57, %c0_58] : memref<1x32xbf16, #tpu.memory_space<vmem>>, vector<1x32xbf16>
    %85 = arith.extf %84 : vector<1x32xbf16> to vector<1x32xf32>
    %86 = vector.broadcast %85 : vector<1x32xf32> to vector<8x32xf32>
    %87 = arith.addf %83, %86 : vector<8x32xf32>
    %88 = arith.truncf %87 : vector<8x32xf32> to vector<8x32xbf16>
    %c0_59 = arith.constant 0 : index
    %c0_60 = arith.constant 0 : index
    %c0_61 = arith.constant 0 : index
    %89 = vector.load %arg10[%c0_59, %c0_60, %c0_61] : memref<1x8x32xbf16, #tpu.memory_space<vmem>>, vector<1x8x32xbf16>
    %90 = vector.shape_cast %89 : vector<1x8x32xbf16> to vector<8x32xbf16>
    %91 = vector.shape_cast %88 : vector<8x32xbf16> to vector<1x8x32xbf16>
    tpu.vector_store %arg10[%c0_59, %c0_60, %c0_61], %91 {strides = array<i32>} : memref<1x8x32xbf16, #tpu.memory_space<vmem>>, vector<1x8x32xbf16>,
    return
  }
  func.func @transform_0(%arg0: i32, %arg1: i32) -> (i32, i32, i32) {
    %c0_i32 = arith.constant 0 : i32
    %c0_i32_0 = arith.constant 0 : i32
    return %arg0, %arg1, %c0_i32 : i32, i32, i32
  }
  func.func @transform_1(%arg0: i32, %arg1: i32) -> (i32, i32, i32) {
    %c0_i32 = arith.constant 0 : i32
    %c0_i32_0 = arith.constant 0 : i32
    %c0_i32_1 = arith.constant 0 : i32
    return %arg0, %c0_i32, %c0_i32_0 : i32, i32, i32
  }
  func.func @transform_2(%arg0: i32, %arg1: i32) -> (i32, i32, i32) {
    %c0_i32 = arith.constant 0 : i32
    %c0_i32_0 = arith.constant 0 : i32
    %c0_i32_1 = arith.constant 0 : i32
    return %arg0, %c0_i32, %c0_i32_0 : i32, i32, i32
  }
  func.func @transform_3(%arg0: i32, %arg1: i32) -> (i32, i32) {
    %c0_i32 = arith.constant 0 : i32
    %c0_i32_0 = arith.constant 0 : i32
    %c0_i32_1 = arith.constant 0 : i32
    return %c0_i32, %c0_i32_0 : i32, i32
  }
  func.func @transform_4(%arg0: i32, %arg1: i32) -> (i32, i32) {
    %c0_i32 = arith.constant 0 : i32
    %c0_i32_0 = arith.constant 0 : i32
    %c0_i32_1 = arith.constant 0 : i32
    return %c0_i32, %c0_i32_0 : i32, i32
  }
  func.func @transform_5(%arg0: i32, %arg1: i32) -> (i32, i32) {
    %c0_i32 = arith.constant 0 : i32
    %c0_i32_0 = arith.constant 0 : i32
    %c0_i32_1 = arith.constant 0 : i32
    return %c0_i32, %c0_i32_0 : i32, i32
  }
  func.func @transform_6(%arg0: i32, %arg1: i32) -> (i32, i32) {
    %c0_i32 = arith.constant 0 : i32
    %c0_i32_0 = arith.constant 0 : i32
    %c0_i32_1 = arith.constant 0 : i32
    return %c0_i32, %c0_i32_0 : i32, i32
  }
  func.func @transform_7(%arg0: i32, %arg1: i32) -> (i32, i32) {
    %c0_i32 = arith.constant 0 : i32
    %c0_i32_0 = arith.constant 0 : i32
    %c0_i32_1 = arith.constant 0 : i32
    return %c0_i32, %c0_i32_0 : i32, i32
  }
  func.func @transform_8(%arg0: i32, %arg1: i32) -> (i32, i32, i32) {
    %c0_i32 = arith.constant 0 : i32
    %c0_i32_0 = arith.constant 0 : i32
    return %arg0, %arg1, %c0_i32 : i32, i32, i32
  }
}

</mosaic_0001>

<bundles_post_ra>
// kernel: tpu_custom_call.1
= control target key start
LH: loop header
LB: loop body
LE: loop exit
PB: predicated region body
PF: predicated region fallthrough
CT: control target
= control target key end

     0   :  { %s2440_s0 = inlined_call_operand.hbm [shape: bf16[2,8,32], index: 0, kind: input, shape index: {}]   ;;  %s2441_s1 = inlined_call_operand.hbm [shape: bf16[2,8,32], index: 1, kind: input, shape index: {}]   ;;  %s2442_s2 = inlined_call_operand.hbm [shape: bf16[2,8,32], index: 2, kind: input, shape index: {}]   ;;  %s2443_s3 = inlined_call_operand.hbm [shape: bf16[32,32], index: 3, kind: input, shape index: {}]   ;;  %s2444_s4 = inlined_call_operand.hbm [shape: bf16[32,32], index: 4, kind: input, shape index: {}]   ;;  %s2445_s5 = inlined_call_operand.hbm [shape: bf16[32,32], index: 5, kind: input, shape index: {}]   ;;  %s2446_s6 = inlined_call_operand.hbm [shape: bf16[32,32], index: 6, kind: input, shape index: {}]   ;;  %s2447_s7 = inlined_call_operand.vmem [shape: bf16[1,32], index: 7, kind: input, shape index: {}]   ;;  %s2448_s8 = inlined_call_operand.hbm [shape: bf16[2,8,32], index: 8, kind: output, shape index: {}]  }
   0x1   :  { %2464 = sst [smem:[#allocation30_spill]] %s2441_s1 }
   0x2   :  { %2465 = sst [smem:[#allocation31_spill]] %s2443_s3 }
   0x3   :  { %2466 = sst [smem:[#allocation32_spill]] %s2444_s4 }
   0x4   :  { %2467 = sst [smem:[#allocation33_spill]] %s2445_s5 }
   0x5   :  { %13 = vsyncpa [#allocation7], 0 }
   0x6   :  { %15 = vsyncpa [#allocation7 + $0x1], 0 }
   0x7   :  { %16 = vsyncpa [#allocation10], 0 }
   0x8   :  { %18 = vsyncpa [#allocation10 + $0x1], 0 }
   0x9   :  { %19 = vsyncpa [#allocation13], 0 }
   0xa   :  { %20 = vsyncpa [#allocation16], 0 }
   0xb   :  { %21 = vsyncpa [#allocation8], 0 }
   0xc   :  { %23 = vsyncpa [#allocation8 + $0x1], 0  ;;  %s2082_s27 = smov 0   ;;  %s2084_s28 = smov 0  }
   0xd   :  { %s2086_s29 = smov 0   ;;  %s2088_s30 = smov 0  }
   0xe   :  { %s2090_s9 = smov 0   ;;  %s2092_s10 = smov 0  }
   0xf LB: > { %2468 = sst [smem:[#allocation24_spill]] %s1997_s27  ;;  %s2113_s11 = sadd.s32 4294967295, %s2017_s10   ;;  %s2017_s10 = sphi %s2092_s10, %s29_s10   ;;  %s2013_s9 = sphi %s2090_s9, %s2504_s9   ;;  %s2009_s30 = sphi %s2088_s30, %s2503_s30   ;;  %s2005_s29 = sphi %s2086_s29, %s2507_s29   ;;  %s2001_s28 = sphi %s2084_s28, %s2506_s28   ;;  %s1997_s27 = sphi %s2082_s27, %s2505_s27  }
  0x10   : > { %2469 = sst [smem:[#allocation25_spill]] %s2013_s9  ;;  %p1413_p0 = scmp.ge.s32.totalorder %s2017_s10, 1 }
  0x11   : > { %2470 = sst [smem:[#allocation26_spill]] %s2017_s10  ;;  %p2458_p1 = scmp.eq.s32.totalorder %s2113_s11, 0 }
  0x12   : > { %p259_p2 = scmp.lt.s32.totalorder %s2017_s10, 3  ;;  %s2019_s13 = smov [#allocation12]  }
  0x13   : > { %s271_s14 = sshll.u32 %s2019_s13, 4  ;;  %s2020_s16 = smov [#allocation15]   ;;  %s272_s14 = int_to_ptr.vmem [resolvable:$true] %s271_s14 }
  0x14   : > { %p2118_p3 = pnand %p1413_p0, %p259_p2  ;;  %s297_s17 = sshll.u32 %s2020_s16, 4  ;;  %s298_s17 = int_to_ptr.vmem [resolvable:$true] %s297_s17 }
  0x15   : > { %s1748_s18 = scalar_lea.vmem %s272_s14, 256  ;;  %p1756_p11 = scmp.lt.s32.totalorder %s272_s14, %s272_s14 }
  0x16   : > { %p1605_p4 = pneg %p2118_p3  ;;  %p1749_p8 = scmp.ne.s32.totalorder %s272_s14, %s1748_s18 }
  0x17   : > { %p1757_p12 = scmp.lt.s32.totalorder %s1748_s18, %s1748_s18 }
  0x18   : > { %p2127_p6 = pnand %p1605_p4, %p2458_p1 }
  0x19   : > { %p1758_p13 = por %p1757_p12, %p1756_p11 }
  0x1a   : > { %p2459_p7 = pneg %p2127_p6 }
  0x1c   : > { %p1751_p9 = pnand %p1749_p8, %p2459_p7 }
  0x1e   : > { %p1752_p10 = pneg %p1751_p9 }
  0x20   : > { %p1759_p0 = pnand %p1758_p13, %p1752_p10 }
  0x22   : > { %1762 = shalt.err (!%p1759_p0)
}
  0x23   : > { %s2449_s19 = smov 64   ;;  %s2451_s20 = smov 4  }
  0x24   : > { %s2473_s3 = sld [smem:[#allocation31_spill]]  ;;  %s1774_s23 = scalar_lea.vmem %s298_s17, 256 }
  0x25   : > { %p1775_p2 = scmp.ne.s32.totalorder %s298_s17, %s1774_s23  ;;  %p1782_p9 = scmp.lt.s32.totalorder %s298_s17, %s298_s17 }
  0x26   : > { %p1783_p10 = scmp.lt.s32.totalorder %s1774_s23, %s1774_s23 }
  0x27   : > { %p1777_p4 = pnand %p1775_p2, %p2459_p7 }
  0x28   : > { %p1784_p11 = por %p1783_p10, %p1782_p9 }
  0x29   : > { %p1778_p8 = pneg %p1777_p4 }
  0x2a   : > { %1608 = dma.hbm_to_vmem [thread:$0]  (!%p2127_p6), %s2473_s3, 256, %s272_s14, [#allocation13], %s2449_s19, %s2449_s19, %s2451_s20  }
  0x2b   : > { %p1785_p12 = pnand %p1784_p11, %p1778_p8 }
  0x2d   : > { %1788 = shalt.err (!%p1785_p12)
}
  0x2e   : > { %s2474_s5 = sld [smem:[#allocation33_spill]]  ;;  %s1412_s26 = sadd.s32 4294967294, %s2017_s10  }
  0x2f   : > { %s41_s13 = sadd.s32 1, %s2013_s9  ;;  %s50_s14 = sadd.s32 1, %s2005_s29 }
  0x30   : > { %p43_p13 = scmp.ge.s32.totalorder %s41_s13, 2  ;;  %p57_p0 = scmp.ne.s32.totalorder %s2005_s29, %s2001_s28 }
  0x31   : > { %p58_p2 = scmp.eq.s32.totalorder %s2017_s10, 0  ;;  %p63_p8 = scmp.ne.s32.totalorder %s2001_s28, %s1997_s27 }
  0x32   : > { %s2509_s13 = smov (%p43_p13, %s41_s13), 0  ;;  %p246_p9 = scmp.eq.s32.totalorder %s2113_s11, 1 }
  0x33   : > { %2475 = sst [smem:[#allocation27_spill]] %s2509_s13  ;;  %p2163_p4 = por %p58_p2, %p57_p0 }
  0x34   : > { %1614 = dma.hbm_to_vmem [thread:$0]  (!%p2127_p6), %s2474_s5, 256, %s298_s17, [#allocation16], %s2449_s19, %s2449_s19, %s2451_s20  }
  0x35   : > { %s45_s17 = ssub.s32 %s2013_s9, %s2509_s13  ;;  %p2174_p11 = por %p2458_p1, %p63_p8 }
  0x36   : > { %p48_p10 = scmp.eq.s32.totalorder %s45_s17, 0  ;;  %p2178_p12 = por %p246_p9, %p57_p0 }
  0x37   : > { %p252_p13 = scmp.eq.s32.totalorder %s1412_s26, 1  ;;  %p1636_p5 = scmp.lt.s32.totalorder %s2017_s10, 2 }
  0x38   : > { %s2478_s21 = scalar_select %p2178_p12, 1, 0 }
  0x39   : > { %s2183_s22 = scalar_select %p48_p10, %s2005_s29, %s50_s14  }
  0x3a   : > { %p2185_p2 = por %p252_p13, %p63_p8  ;;  %s2455_s24 = sand.u32 1, %s2005_s29  }
  0x3b   : > { %2479 = sst [smem:[#allocation28_spill]] %s2183_s22  ;;  %s2192_s25 = sshll.u32 %s2013_s9, 6 }
  0x3c   : > { %s2480_s23 = scalar_select %p2185_p2, 1, 0 }
  0x3d   : > { %s2196_s17 = sshll.u32 %s2455_s24, 2  ;;  %p2200_p0 = pnand %p1636_p5, %p2163_p4 }
  0x3e   : > { %2481 = sst [smem:[#allocation29_spill]] %s2480_s23  ;;  %s346_s26 = sand.u32 1, %s2017_s10  }
  0x3f   : > { %s2483_s1 = sld [smem:[#allocation30_spill]]  ;;  %s350_s5 = scalar_lea.vmem [#allocation9], %s2196_s17 }
  0x40   : > { %s357_s13 = sshll.u32 %s350_s5, 4  ;;  %s2210_s9 = scalar_lea.sflag [#allocation10], %s346_s26  ;;  %s358_s13 = int_to_ptr.vmem [resolvable:$true] %s357_s13 }
  0x41   : > { %p2460_p8 = pneg %p2200_p0  ;;  %s1802_s16 = scalar_lea.vmem %s358_s13, 64 }
  0x42   : > { %p1803_p9 = scmp.ne.s32.totalorder %s358_s13, %s1802_s16  ;;  %s2023_s24 = smov [#allocation9]  }
  0x43   : > { %s1807_s22 = sshll.u32 %s2023_s24, 4  ;;  %s1808_s22 = int_to_ptr.vmem [resolvable:$false] %s1807_s22 }
  0x44   : > { %p1805_p5 = pnand %p1803_p9, %p2460_p8  ;;  %s1809_s10 = scalar_lea.vmem %s1808_s22, 128 }
  0x45   : > { %s355_s3 = scalar_lea.hbm %s2483_s1, %s2192_s25  ;;  %p1810_p10 = scmp.lt.s32.totalorder %s358_s13, %s1808_s22 }
  0x46   : > { %p1806_p4 = pneg %p1805_p5  ;;  %p1811_p13 = scmp.lt.s32.totalorder %s1809_s10, %s1802_s16 }
  0x48   : > { %p1812_p1 = por %p1811_p13, %p1810_p10 }
  0x4a   : > { %p1813_p7 = pnand %p1812_p1, %p1806_p4 }
  0x4c   : > { %1816 = shalt.err (!%p1813_p7)
}
  0x4d   : > { %1624 = dma.hbm_to_vmem [thread:$0]  (!%p2200_p0), %s355_s3, 64, %s358_s13, %s2210_s9  }
  0x4e   : > { %s2024_s5 = smov [#allocation14]   ;;  %s2025_s26 = smov [#allocation17]  }
  0x4f   : > { %s284_s20 = sshll.u32 %s2024_s5, 4  ;;  %s310_s14 = sshll.u32 %s2025_s26, 4  ;;  %s285_s20 = int_to_ptr.vmem [resolvable:$true] %s284_s20  ;;  %s311_s14 = int_to_ptr.vmem [resolvable:$true] %s310_s14 }
  0x50   : > { %s1828_s1 = scalar_lea.vmem %s285_s20, 256  ;;  %p2484_p5 = pneg %p2127_p6 }
  0x51   : > { %p1829_p9 = scmp.ne.s32.totalorder %s285_s20, %s1828_s1  ;;  %p1836_p12 = scmp.lt.s32.totalorder %s285_s20, %s285_s20 }
  0x52   : > { %p1837_p10 = scmp.lt.s32.totalorder %s1828_s1, %s1828_s1 }
  0x53   : > { %p1831_p8 = pnand %p1829_p9, %p2484_p5 }
  0x54   : > { %p1838_p1 = por %p1837_p10, %p1836_p12 }
  0x55   : > { %p1832_p2 = pneg %p1831_p8 }
  0x57   : > { %p1839_p7 = pnand %p1838_p1, %p1832_p2 }
  0x59   : > { %1842 = shalt.err (!%p1839_p7)
}
  0x5a   : > { %s2485_s10 = smov 4   ;;  %s2486_s3 = smov 64  }
  0x5b   : > { %s2487_s4 = sld [smem:[#allocation32_spill]]  ;;  %s1854_s24 = scalar_lea.vmem %s311_s14, 256 }
  0x5c   : > { %p1855_p4 = scmp.ne.s32.totalorder %s311_s14, %s1854_s24  ;;  %p2488_p8 = pmov %p2484_p5 }
  0x5d   : > { %p1862_p12 = scmp.lt.s32.totalorder %s311_s14, %s311_s14  ;;  %p1863_p2 = scmp.lt.s32.totalorder %s1854_s24, %s1854_s24 }
  0x5e   : > { %p1857_p13 = pnand %p1855_p4, %p2488_p8 }
  0x5f   : > { %p1864_p5 = por %p1863_p2, %p1862_p12 }
  0x60   : > { %p1858_p9 = pneg %p1857_p13 }
  0x61   : > { %1611 = dma.hbm_to_vmem [thread:$0]  (!%p2127_p6), %s2487_s4, 256, %s285_s20, [#allocation13], %s2486_s3, %s2486_s3, %s2485_s10  }
  0x62   : > { %p1865_p10 = pnand %p1864_p5, %p1858_p9 }
  0x64   : > { %1868 = shalt.err (!%p1865_p10)
}
  0x65   : > { %1617 = dma.hbm_to_vmem [thread:$0]  (!%p2127_p6), %s2446_s6, 256, %s311_s14, [#allocation16], %s2486_s3, %s2486_s3, %s2485_s10  }
  0x66   : > { %s337_s26 = scalar_lea.hbm %s2440_s0, %s2192_s25  ;;  %s331_s13 = scalar_lea.vmem [#allocation6], %s2196_s17 }
  0x67   : > { %s339_s22 = sshll.u32 %s331_s13, 4  ;;  %s373_s4 = scalar_lea.hbm %s2442_s2, %s2192_s25  ;;  %s340_s22 = int_to_ptr.vmem [resolvable:$true] %s339_s22 }
  0x68   : > { %s2489_s23 = sand.u32 1, %s2005_s29   ;;  %s1882_s1 = scalar_lea.vmem %s340_s22, 64 }
  0x69   : > { %s328_s27 = scalar_lea.sflag [#allocation7], %s2489_s23  ;;  %p1883_p1 = scmp.ne.s32.totalorder %s340_s22, %s1882_s1 }
  0x6a   : > { %p2490_p7 = pneg %p2200_p0  ;;  %s2026_s14 = smov [#allocation6]  }
  0x6b   : > { %s1887_s10 = sshll.u32 %s2026_s14, 4  ;;  %s1888_s10 = int_to_ptr.vmem [resolvable:$false] %s1887_s10 }
  0x6c   : > { %p1885_p4 = pnand %p1883_p1, %p2490_p7  ;;  %s1889_s3 = scalar_lea.vmem %s1888_s10, 128 }
  0x6d   : > { %p1890_p6 = scmp.lt.s32.totalorder %s340_s22, %s1888_s10  ;;  %p1891_p13 = scmp.lt.s32.totalorder %s1889_s3, %s1882_s1 }
  0x6e   : > { %p1886_p8 = pneg %p1885_p4 }
  0x6f   : > { %p1892_p9 = por %p1891_p13, %p1890_p6 }
  0x71   : > { %p1893_p12 = pnand %p1892_p9, %p1886_p8 }
  0x73   : > { %1896 = shalt.err (!%p1893_p12)
}
  0x74   : > { %1621 = dma.hbm_to_vmem [thread:$0]  (!%p2200_p0), %s337_s26, 64, %s340_s22, %s328_s27  }
  0x75   : > { %s368_s23 = scalar_lea.vmem [#allocation11], %s2196_s17  ;;  %p2491_p5 = pmov %p2490_p7 }
  0x76   : > { %s375_s16 = sshll.u32 %s368_s23, 4  ;;  %s2027_s20 = smov [#allocation11]   ;;  %s376_s16 = int_to_ptr.vmem [resolvable:$true] %s375_s16 }
  0x77   : > { %s1910_s5 = scalar_lea.vmem %s376_s16, 64  ;;  %s1915_s13 = sshll.u32 %s2027_s20, 4  ;;  %s1916_s13 = int_to_ptr.vmem [resolvable:$false] %s1915_s13 }
  0x78   : > { %p1911_p2 = scmp.ne.s32.totalorder %s376_s16, %s1910_s5  ;;  %s1917_s15 = scalar_lea.vmem %s1916_s13, 128 }
  0x79   : > { %p1918_p7 = scmp.lt.s32.totalorder %s376_s16, %s1916_s13  ;;  %p1919_p4 = scmp.lt.s32.totalorder %s1917_s15, %s1910_s5 }
  0x7a   : > { %p1913_p10 = pnand %p1911_p2, %p2491_p5 }
  0x7b   : > { %p1920_p8 = por %p1919_p4, %p1918_p7 }
  0x7c   : > { %p1914_p1 = pneg %p1913_p10 }
  0x7e   : > { %p1921_p6 = pnand %p1920_p8, %p1914_p1 }
  0x80   : > { %1924 = shalt.err (!%p1921_p6)
}
  0x81   : > { %1627 = dma.hbm_to_vmem [thread:$0]  (!%p2200_p0), %s373_s4, 64, %s376_s16, %s2210_s9  }
  0x82   : > { %384 = sbr.rel (%p2118_p3) target bundleno = 1536 (0x600), region = 52  ;;  %s2273_s26 = sand.u32 (!%p2118_p3), 1, %s2001_s28  }
  0x83   : > { %s2276_s22 = sshll.u32 (!%p2118_p3), %s2273_s26, 2  ;;  %s387_s19 = scalar_lea.sflag (!%p2118_p3), [#allocation7], %s2273_s26 }
  0x84   : > { %s390_s24 = scalar_lea.vmem (!%p2118_p3), [#allocation6], %s2276_s22 }
  0x87   : > { %1976 = dma.done.wait (%p2174_p11), %s387_s19, 64  }
  0x88   : > { %1978 = vsyncadd (%p2174_p11), %s387_s19, 4294967232  ;;  %s395_s4 = sand.u32 1, %s2113_s11   ;;  %s399_s12 = scalar_lea.vmem [#allocation9], %s2276_s22 }
  0x89   : > { %s396_s9 = scalar_lea.sflag [#allocation10], %s395_s4 }
  0x8a   : > { %1980 = dma.done.wait (%p2174_p11), %s396_s9, 128  }
  0x8b   : > { %1982 = vsyncadd (%p2174_p11), %s396_s9, 4294967168  ;;  %s408_s25 = scalar_lea.vmem [#allocation11], %s2276_s22  ;;  %p2492_p3 = scmp.eq.s32.totalorder %s2113_s11, 0 }
  0x8d   : > { %1984 = dma.done.wait (%p2492_p3), [#allocation13], 512   ;;  %p2493_p0 = pmov %p2492_p3 }
  0x8f   : > { %1986 = vsyncadd (%p2493_p0), [#allocation13], 4294966784  ;;  %p2494_p13 = pmov %p2493_p0 }
  0x90   : > { %p2495_p9 = pmov %p2493_p0 }
  0x91   : > { %1988 = dma.done.wait (%p2494_p13), [#allocation16], 512  }
  0x92   : > { %1990 = vsyncadd (%p2495_p9), [#allocation16], 4294966784  ;;  %v2028_v0 = vmov 0.0   ;;  %vm2029_vm0 = vmmov 0   ;;  %v1704_v1 = vld [vmem:[#allocation14 + $0x8] sm:$0xff]   ;;  %v1705_v2 = vld [vmem:[#allocation14] sm:$0xff]  }
  0x93   : > { %1501 = vmatprep.subr.bf16.mxu0 %v2028_v0  ;;  %1505 = vmatprep.mubr.msk.bf16.mxu0 %vm2029_vm0, %v2028_v0  ;;  %v472_v3 = vld [vmem:[%s399_s12] sm:$0xf]  ;;  %vm489_vm1 = vcmask 261120   ;;  %v1706_v4 = vld [vmem:[#allocation12 + $0x8] sm:$0xff]   ;;  %v1707_v5 = vld [vmem:[#allocation12] sm:$0xff]   ;;  %vm534_vm2 = vcmask 257024  }
  0x94   : > { %1509 = vmatprep.subr.bf16.mxu1 %v2028_v0  ;;  %1513 = vmatprep.mubr.msk.bf16.mxu1 %vm2029_vm0, %v2028_v0  ;;  %v598_v6 = vld [vmem:[%s390_s24] sm:$0xf]  ;;  %v1709_v8 = vld [vmem:[#allocation15] sm:$0xff]   ;;  %v536_v9 = vld [vmem:[%s408_s25] sm:$0xf]  ;;  %vm665_vm3 = vcmask 64512  }
  0x95   : > { %1502 = vmatpush3.bf16.msra.mxu0 %v1704_v1  ;;  %v1708_v7 = vld [vmem:[#allocation15 + $0x8] sm:$0xff]   ;;  %s2030_s11 = smov 112   ;;  %s2031_s18 = smov 120   ;;  %vm727_vm4 = vcmask 1043456   ;;  %vm772_vm5 = vcmask 60416   ;;  %vm903_vm6 = vcmask 126016  }
  0x96   : > { %1503 = vmatprep.subr.bf16.mxu0 %v2028_v0  ;;  %1510 = vmatpush3.bf16.msra.mxu1 %v1708_v7  ;;  %s2032_s1 = smov 104   ;;  %s2033_s14 = smov 8   ;;  %vm1034_vm7 = vcmask 191616   ;;  %vm1165_vm8 = vcmask 257216  }
  0x97   : > { %1511 = vmatprep.subr.bf16.mxu1 %v2028_v0  ;;  %s2034_s10 = smov 16   ;;  %s2035_s3 = smov 24  }
  0x98   : > { %s1467_s5 = sshll.u32 %s2009_s30, 6  ;;  %s466_s20 = scalar_lea.vmem [#allocation18], %s2276_s22 }
  0x99   : > { %1504 = vmatpush3.bf16.msra.mxu0 %v1705_v2  ;;  %s1250_s13 = sshll.u32 %s466_s20, 4  ;;  %s2391_s17 = scalar_lea.hbm %s2448_s8, %s1467_s5  ;;  %s2393_s13 = int_to_ptr.vmem [resolvable:$true] %s1250_s13 }
  0x9a   : > { %1517 = vmatprep.subr.bf16.mxu0 %v2028_v0  ;;  %1512 = vmatpush3.bf16.msra.mxu1 %v1709_v8  ;;  %s1236_s30 = scalar_lea.sflag [#allocation8], %s2273_s26  ;;  %s1925_s22 = scalar_lea.vmem %s2393_s13, 64 }
  0x9b   : > { %1525 = vmatprep.subr.bf16.mxu1 %v2028_v0  ;;  %p1926_p11 = scmp.ne.s32.totalorder %s2393_s13, %s1925_s22  ;;  %p2496_p12 = scmp.ne.s32.totalorder %s2478_s21, 0 }
  0x9c   : > { %1506 = vmatmul.mubr.msk.bf16.vlgmr.msra.gmra.mxu0 %vm489_vm1, %v472_v3  ;;  %s2036_s19 = smov [#allocation18]  }
  0x9d   : > { %1518 = vmatpush3.bf16.msra.mxu0 %v1706_v4  ;;  %1521 = vmatprep.mubr.msk.bf16.mxu0 %vm2029_vm0, %v2028_v0  ;;  %p1927_p2 = pnand %p1926_p11, %p2496_p12  ;;  %s1929_s24 = sshll.u32 %s2036_s19, 4  ;;  %s1930_s24 = int_to_ptr.vmem [resolvable:$false] %s1929_s24 }
  0x9e   : > { %1519 = vmatprep.subr.bf16.mxu0 %v2028_v0  ;;  %1514 = vmatmul.mubr.msk.bf16.vlgmr.msra.gmra.mxu1 %vm489_vm1, %v536_v9  ;;  %s1931_s4 = scalar_lea.vmem %s1930_s24, 128  ;;  %p1932_p10 = scmp.lt.s32.totalorder %s2393_s13, %s1930_s24 }
  0x9f   : > { %1527 = vmatprep.mubr.msk.bf16.mxu1 %vm2029_vm0, %v2028_v0  ;;  %p1928_p5 = pneg %p1927_p2  ;;  %p1933_p1 = scmp.lt.s32.totalorder %s1931_s4, %s1925_s22 }
  0xa1   : > { %1520 = vmatpush3.bf16.msra.mxu0 %v1707_v5  ;;  %p1934_p7 = por %p1933_p1, %p1932_p10 }
  0xa2   : > { %1531 = vmatprep.subr.bf16.mxu0 %v2028_v0 }
  0xa3   : > { %p1935_p4 = pnand %p1934_p7, %p1928_p5 }
  0xa4   : > { %1522 = vmatmul.mubr.msk.bf16.vlgmr.msra.gmra.mxu0 %vm489_vm1, %v598_v6 }
  0xa5   : > { %1533 = vmatprep.mubr.msk.bf16.mxu0 %vm2029_vm0, %v2028_v0 }
 0x15c   : > { %v527_v10 = vpop.f32.mrf.mxu0 }
 0x15d   : > { %v533_v11 = vpack.c.bf16 %v527_v10, %v527_v10 }
 0x15e   : > { %v1507_v12 = vpop.f32.mrf.mxu0  ;;  %v590_v29 = vpop.f32.mrf.mxu1 }
 0x15f   : > { %535 = vst.msk [vmem:[#allocation3] sm:$0xf] %vm534_vm2, %v533_v11  ;;  %v596_v30 = vpack.c.bf16 %v590_v29, %v590_v29 }
 0x160   : > { %v530_v13 = vpop.f32.mrf.mxu0  ;;  %v1515_v31 = vpop.f32.mrf.mxu1 }
 0x161   : > { %597 = vst.msk [vmem:[#allocation4] sm:$0xf] %vm534_vm2, %v596_v30 }
 0x162   : > { %v1508_v14 = vpop.f32.mrf.mxu0  ;;  %v593_v32 = vpop.f32.mrf.mxu1 }
 0x164   : > { %v653_v15 = vpop.f32.mrf.mxu0  ;;  %v1516_v33 = vpop.f32.mrf.mxu1 }
 0x165   : > { %v659_v16 = vpack.c.bf16 %v653_v15, %v653_v15 }
 0x166   : > { %v1523_v17 = vpop.f32.mrf.mxu0  ;;  %v663_v18 = vld [vmem:[#allocation3] sm:$0xf] }
 0x167   : > { %v1710_v19 = vld [vmem:[#allocation3] ss:$0 sps:$4 sm:$0xff]   ;;  %661 = vst.msk [vmem:[#allocation2] sm:$0xf] %vm534_vm2, %v659_v16  ;;  %v670_v20 = vsel %vm665_vm3, %v663_v18, 0 }
 0x168   : > { %v1711_v21 = vld [vmem:[#allocation3] ss:$0 sps:$4 sm:$0xff]   ;;  %v656_v22 = vpop.f32.mrf.mxu0  ;;  %1526 = vmatpush3.bf16.xpose.msra.mxu1 %v670_v20  ;;  %916 = vrot.lane.b32.xlu1 %v1710_v19, %s2030_s11  ;;  %v664_v34 = vld [vmem:[#allocation4] sm:$0xf] }
 0x169   : > { %785 = vrot.lane.b32.xlu0 %v1711_v21, %s2031_s18  ;;  %1537 = vmatprep.subr.bf16.mxu1 %v2028_v0  ;;  %v1715_v28 = vld [vmem:[#allocation3] ss:$0 sps:$4 sm:$0xff]   ;;  %v729_v35 = vsel %vm727_vm4, %v664_v34, 0  ;;  %v1716_v7 = vld [vmem:[#allocation4] ss:$0 sps:$4 sm:$0xff]  }
 0x16a   : > { %v1524_v23 = vpop.f32.mrf.mxu0  ;;  %1532 = vmatpush3.bf16.msra.mxu0 %v729_v35 }
 0x16b   : > { %1543 = vmatprep.subr.bf16.mxu0 %v2028_v0 }
 0x16e   : > { %v662_v24 = vld [vmem:[#allocation2] sm:$0xf] }
 0x16f   : > { %v1712_v25 = vld [vmem:[#allocation2] ss:$0 sps:$4 sm:$0xff]   ;;  %1528 = vmatmul.mubr.msk.bf16.vlgmr.msra.gmra.mxu1 %vm665_vm3, %v662_v24  ;;  %v1717_v24 = vld [vmem:[#allocation4] ss:$0 sps:$4 sm:$0xff]  }
 0x170   : > { %v1713_v26 = vld [vmem:[#allocation2] ss:$0 sps:$4 sm:$0xff]   ;;  %911 = vrot.lane.b32.xlu1 %v1712_v25, %s2030_s11  ;;  %1539 = vmatprep.mubr.msk.bf16.mxu1 %vm2029_vm0, %v2028_v0 }
 0x171   : > { %780 = vrot.lane.b32.xlu0 %v1713_v26, %s2031_s18  ;;  %v1714_v27 = vld [vmem:[#allocation2] ss:$0 sps:$4 sm:$0xff]  }
 0x174   : > { %1042 = vrot.lane.b32.xlu1 %v1714_v27, %s2032_s1 }
 0x175   : > { %1047 = vrot.lane.b32.xlu0 %v1715_v28, %s2032_s1  ;;  %v1718_v28 = vld [vmem:[#allocation4] ss:$0 sps:$4 sm:$0xff]  }
 0x1da   : > { %v917_v38 = vpop.permute.xlu1 %916 }
 0x1db   : > { %v786_v36 = vpop.permute.xlu0 %785  ;;  %v922_v40 = vsel %vm665_vm3, %v917_v38, 0 }
 0x1dc   : > { %v791_v37 = vsel %vm665_vm3, %v786_v36, 0 }
 0x1dd   : > { %1538 = vmatpush3.bf16.xpose.msra.mxu1 %v791_v37 }
 0x1de   : > { %1549 = vmatprep.subr.bf16.mxu1 %v2028_v0 }
 0x1e2   : > { %v912_v42 = vpop.permute.xlu1 %911 }
 0x1e3   : > { %v781_v39 = vpop.permute.xlu0 %780 }
 0x1e4   : > { %1540 = vmatmul.mubr.msk.bf16.vlgmr.msra.gmra.mxu1 %vm665_vm3, %v781_v39 }
 0x1e5   : > { %1550 = vmatpush3.bf16.xpose.msra.mxu1 %v922_v40  ;;  %1551 = vmatprep.mubr.msk.bf16.mxu1 %vm2029_vm0, %v2028_v0 }
 0x1e6   : > { %1561 = vmatprep.subr.bf16.mxu1 %v2028_v0  ;;  %v1043_v44 = vpop.permute.xlu1 %1042 }
 0x1e7   : > { %v1048_v41 = vpop.permute.xlu0 %1047 }
 0x1e8   : > { %v1053_v43 = vsel %vm665_vm3, %v1048_v41, 0 }
 0x1ec   : > { %1552 = vmatmul.mubr.msk.bf16.vlgmr.msra.gmra.mxu1 %vm665_vm3, %v912_v42 }
 0x1ed   : > { %1562 = vmatpush3.bf16.xpose.msra.mxu1 %v1053_v43  ;;  %1563 = vmatprep.mubr.msk.bf16.mxu1 %vm2029_vm0, %v2028_v0 }
 0x1ee   : > { %1573 = vmatprep.subr.bf16.mxu1 %v2028_v0 }
 0x1f4   : > { %1564 = vmatmul.mubr.msk.bf16.vlgmr.msra.gmra.mxu1 %vm665_vm3, %v1043_v44 }
 0x1f5   : > { %1577 = vmatprep.mubr.msk.bf16.mxu1 %vm2029_vm0, %v2028_v0 }
 0x22f   : > { %v706_v45 = vpop.f32.mrf.mxu1 }
 0x230   : > { %v712_v46 = vsel %vm665_vm3, %v706_v45, -inf }
 0x231   : > { %713 = vmax.xlane.f32.xlu0 %v712_v46  ;;  %v1529_v47 = vpop.f32.mrf.mxu1 }
 0x233   : > { %v709_v48 = vpop.f32.mrf.mxu1 }
 0x235   : > { %v1530_v49 = vpop.f32.mrf.mxu1 }
 0x2a4   : > { %v827_v50 = vpop.f32.mrf.mxu1 }
 0x2a5   : > { %v833_v51 = vsel %vm665_vm3, %v827_v50, -inf }
 0x2a6   : > { %834 = vmax.xlane.f32.xlu1 %v833_v51  ;;  %v1541_v52 = vpop.f32.mrf.mxu1 }
 0x2a8   : > { %v830_v53 = vpop.f32.mrf.mxu1 }
 0x2aa   : > { %v1542_v54 = vpop.f32.mrf.mxu1 }
 0x2ac   : > { %v958_v55 = vpop.f32.mrf.mxu1 }
 0x2ad   : > { %v964_v56 = vsel %vm665_vm3, %v958_v55, -inf }
 0x2ae   : > { %965 = vmax.xlane.f32.xlu0 %v964_v56  ;;  %v1553_v57 = vpop.f32.mrf.mxu1 }
 0x2af   : > { %v1719_v57 = vld [vmem:[#allocation17 + $0x8] sm:$0xff]  }
 0x2b0   : > { %v961_v58 = vpop.f32.mrf.mxu1  ;;  %1574 = vmatpush3.bf16.msra.mxu1 %v1719_v57 }
 0x2b1   : > { %1575 = vmatprep.subr.bf16.mxu1 %v2028_v0 }
 0x2b2   : > { %v1554_v59 = vpop.f32.mrf.mxu1 }
 0x2b3   : > { %v1720_v59 = vld [vmem:[#allocation17] sm:$0xff]  }
 0x2b4   : > { %v1089_v60 = vpop.f32.mrf.mxu1  ;;  %1576 = vmatpush3.bf16.msra.mxu1 %v1720_v59 }
 0x2b5   : > { %v1095_v61 = vsel %vm665_vm3, %v1089_v60, -inf }
 0x2b6   : > { %1096 = vmax.xlane.f32.xlu0 %v1095_v61  ;;  %v1565_v62 = vpop.f32.mrf.mxu1 }
 0x2b8   : > { %v1092_v63 = vpop.f32.mrf.mxu1 }
 0x2ba   : > { %v714_v1 = vpop.xlane.xlu0 %713  ;;  %v1566_v2 = vpop.f32.mrf.mxu1 }
 0x2bb   : > { %v715_v3 = vsub.f32 %v706_v45, %v714_v1 }
 0x2bd   : > { %v716_v4 = vmul.f32 1.442695, %v715_v3 }
 0x2bf   : > { %1721 = vpow2.f32 %v716_v4 }
 0x2cc   : > { %v1722_v5 = vpop.eup %1721 }
 0x2cd   : > { %v718_v6 = vsel %vm665_vm3, %v1722_v5, 0.0 }
 0x2ce   : > { %719 = vadd.xlane.f32.xlu1 %v718_v6 }
 0x2df   : > { %848 = vrot.lane.b32.xlu1 %v1716_v7, %s2031_s18 }
 0x32f   : > { %v835_v8 = vpop.xlane.xlu1 %834 }
 0x330   : > { %v836_v9 = vsub.f32 %v827_v50, %v835_v8 }
 0x332   : > { %v837_v10 = vmul.f32 1.442695, %v836_v9  ;;  %v1174_v9 = vlaneseq }
 0x334   : > { %1723 = vpow2.f32 %v837_v10  ;;  %v1175_v10 = vshrl.u32 %v1174_v9, 7 }
 0x337   : > { %v966_v11 = vpop.xlane.xlu0 %965 }
 0x338   : > { %v967_v12 = vsub.f32 %v958_v55, %v966_v11  ;;  %v1172_v11 = vld [vmem:[%s2447_s7] sm:$0x1] }
 0x33a   : > { %v968_v13 = vmul.f32 1.442695, %v967_v12  ;;  %v1173_v12 = vunpack.c.l.bf16 %v1172_v11 }
 0x33c   : > { %1725 = vpow2.f32 %v968_v13  ;;  %v1176_v13 = vsub.s32 0, %v1175_v10 }
 0x33f   : > { %v1097_v14 = vpop.xlane.xlu0 %1096 }
 0x340   : > { %v1098_v15 = vsub.f32 %v1089_v60, %v1097_v14  ;;  %v1177_v14 = vrot.slane %v1173_v12, %v1176_v13 }
 0x341   : > { %v1724_v16 = vpop.eup %1723 }
 0x342   : > { %v1099_v17 = vmul.f32 1.442695, %v1098_v15  ;;  %v839_v18 = vsel %vm665_vm3, %v1724_v16, 0.0 }
 0x343   : > { %840 = vadd.xlane.f32.xlu0 %v839_v18 }
 0x344   : > { %1727 = vpow2.f32 %v1099_v17 }
 0x349   : > { %v1726_v19 = vpop.eup %1725 }
 0x34a   : > { %v970_v20 = vsel %vm665_vm3, %v1726_v19, 0.0 }
 0x34b   : > { %971 = vadd.xlane.f32.xlu1 %v970_v20 }
 0x351   : > { %v1728_v21 = vpop.eup %1727 }
 0x352   : > { %v1101_v22 = vsel %vm665_vm3, %v1728_v21, 0.0 }
 0x353   : > { %1102 = vadd.xlane.f32.xlu0 %v1101_v22 }
 0x357   : > { %v720_v23 = vpop.xlane.xlu1 %719 }
 0x358   : > { %1729 = vrcp.f32 %v720_v23 }
 0x35b   : > { %v849_v27 = vpop.permute.xlu1 %848 }
 0x35c   : > { %1110 = vrot.lane.b32.xlu1 %v1717_v24, %s2032_s1  ;;  %v854_v30 = vsel %vm727_vm4, %v849_v27, 0 }
 0x365   : > { %v1730_v25 = vpop.eup %1729 }
 0x366   : > { %v722_v26 = vmul.f32 %v1730_v25, %v1722_v5 }
 0x368   : > { %v723_v29 = vpack.c.bf16 %v722_v26, %v722_v26 }
 0x369   : > { %979 = vrot.lane.b32.xlu0 %v1718_v28, %s2030_s11 }
 0x36a   : > { %1534 = vmatmul.mubr.msk.bf16.vlgmr.msra.gmra.mxu0 %vm665_vm3, %v723_v29 }
 0x36b   : > { %1544 = vmatpush3.bf16.msra.mxu0 %v854_v30  ;;  %1545 = vmatprep.mubr.msk.bf16.mxu0 %vm2029_vm0, %v2028_v0 }
 0x36c   : > { %1555 = vmatprep.subr.bf16.mxu0 %v2028_v0 }
 0x3cc   : > { %v841_v31 = vpop.xlane.xlu0 %840 }
 0x3cd   : > { %1731 = vrcp.f32 %v841_v31 }
 0x3d4   : > { %v972_v32 = vpop.xlane.xlu1 %971 }
 0x3d5   : > { %1733 = vrcp.f32 %v972_v32 }
 0x3d8   : > { %v1111_v41 = vpop.permute.xlu1 %1110 }
 0x3d9   : > { %v1116_v43 = vsel %vm727_vm4, %v1111_v41, 0 }
 0x3da   : > { %v1732_v33 = vpop.eup %1731 }
 0x3db   : > { %v843_v34 = vmul.f32 %v1732_v33, %v1724_v16 }
 0x3dc   : > { %v1103_v35 = vpop.xlane.xlu0 %1102 }
 0x3dd   : > { %1735 = vrcp.f32 %v1103_v35  ;;  %v844_v36 = vpack.c.bf16 %v843_v34, %v843_v34 }
 0x3df   : > { %1546 = vmatmul.mubr.msk.bf16.vlgmr.msra.gmra.mxu0 %vm665_vm3, %v844_v36 }
 0x3e0   : > { %v980_v37 = vpop.permute.xlu0 %979  ;;  %1557 = vmatprep.mubr.msk.bf16.mxu0 %vm2029_vm0, %v2028_v0 }
 0x3e1   : > { %v985_v38 = vsel %vm727_vm4, %v980_v37, 0 }
 0x3e2   : > { %v1734_v39 = vpop.eup %1733  ;;  %1556 = vmatpush3.bf16.msra.mxu0 %v985_v38 }
 0x3e3   : > { %1567 = vmatprep.subr.bf16.mxu0 %v2028_v0  ;;  %v974_v40 = vmul.f32 %v1734_v39, %v1726_v19 }
 0x3e5   : > { %v975_v42 = vpack.c.bf16 %v974_v40, %v974_v40 }
 0x3e7   : > { %1558 = vmatmul.mubr.msk.bf16.vlgmr.msra.gmra.mxu0 %vm665_vm3, %v975_v42 }
 0x3e8   : > { %1568 = vmatpush3.bf16.msra.mxu0 %v1116_v43  ;;  %1569 = vmatprep.mubr.msk.bf16.mxu0 %vm2029_vm0, %v2028_v0 }
 0x3ea   : > { %v1736_v44 = vpop.eup %1735 }
 0x3eb   : > { %v1105_v45 = vmul.f32 %v1736_v44, %v1728_v21 }
 0x3ed   : > { %v1106_v46 = vpack.c.bf16 %v1105_v45, %v1105_v45 }
 0x3ef   : > { %1570 = vmatmul.mubr.msk.bf16.vlgmr.msra.gmra.mxu0 %vm665_vm3, %v1106_v46 }
 0x42a   : > { %v765_v47 = vpop.f32.mrf.mxu0 }
 0x42b   : > { %v771_v48 = vpack.c.bf16 %v765_v47, %v765_v47 }
 0x42c   : > { %v1535_v49 = vpop.f32.mrf.mxu0 }
 0x42d   : > { %773 = vst.msk [vmem:[#allocation5] sm:$0xf] %vm772_vm5, %v771_v48 }
 0x42e   : > { %v768_v50 = vpop.f32.mrf.mxu0 }
 0x430   : > { %v1536_v51 = vpop.f32.mrf.mxu0 }
 0x49f   : > { %v890_v52 = vpop.f32.mrf.mxu0 }
 0x4a0   : > { %v1470_v53 = vpack.c.bf16 %v890_v52, %v890_v52 }
 0x4a1   : > { %v1547_v54 = vpop.f32.mrf.mxu0 }
 0x4a2   : > { %900 = vrot.lane.b32.xlu1 %v1470_v53, %s2033_s14 }
 0x4a3   : > { %v893_v55 = vpop.f32.mrf.mxu0 }
 0x4a5   : > { %v1548_v56 = vpop.f32.mrf.mxu0 }
 0x4a7   : > { %v1021_v58 = vpop.f32.mrf.mxu0 }
 0x4a8   : > { %v1471_v60 = vpack.c.bf16 %v1021_v58, %v1021_v58 }
 0x4a9   : > { %v1559_v61 = vpop.f32.mrf.mxu0 }
 0x4aa   : > { %1031 = vrot.lane.b32.xlu0 %v1471_v60, %s2034_s10 }
 0x4ab   : > { %v1024_v62 = vpop.f32.mrf.mxu0 }
 0x4ad   : > { %v1560_v63 = vpop.f32.mrf.mxu0 }
 0x4af   : > { %v1152_v1 = vpop.f32.mrf.mxu0 }
 0x4b0   : > { %v1472_v2 = vpack.c.bf16 %v1152_v1, %v1152_v1 }
 0x4b1   : > { %v1571_v3 = vpop.f32.mrf.mxu0 }
 0x4b2   : > { %1162 = vrot.lane.b32.xlu1 %v1472_v2, %s2035_s3 }
 0x4b3   : > { %v1155_v4 = vpop.f32.mrf.mxu0 }
 0x4b5   : > { %v1572_v5 = vpop.f32.mrf.mxu0 }
 0x514   : > { %v901_v6 = vpop.permute.xlu1 %900 }
 0x515   : > { %904 = vst.msk [vmem:[#allocation5] sm:$0xf] %vm903_vm6, %v901_v6 }
 0x51c   : > { %v1032_v0 = vpop.permute.xlu0 %1031 }
 0x51d   : > { %1035 = vst.msk [vmem:[#allocation5] sm:$0xf] %vm1034_vm7, %v1032_v0 }
 0x524   : > { %v1163_v7 = vpop.permute.xlu1 %1162 }
 0x525   : > { %1166 = vst.msk [vmem:[#allocation5] sm:$0xf] %vm1165_vm8, %v1163_v7 }
 0x52c   : > { %v1167_v8 = vld [vmem:[#allocation5] sm:$0xf] }
 0x52d   : > { %1578 = vmatmul.mubr.msk.bf16.vlgmr.msra.gmra.mxu1 %vm489_vm1, %v1167_v8 }
 0x5ed   : > { %v1227_v15 = vpop.f32.mrf.mxu1 }
 0x5ee   : > { %v1228_v16 = vadd.f32 %v1227_v15, %v1177_v14 }
 0x5ef   : > { %v1579_v17 = vpop.f32.mrf.mxu1 }
 0x5f0   : > { %v1233_v18 = vpack.c.bf16 %v1228_v16, %v1228_v16 }
 0x5f1   : > { %v1230_v19 = vpop.f32.mrf.mxu1 }
 0x5f2   : > { %1234 = vst.msk [vmem:[%s466_s20] sm:$0xf] %vm534_vm2, %v1233_v18 }
 0x5f3   : > { %v1580_v20 = vpop.f32.mrf.mxu1 }
 0x5f4   : > { %1938 = shalt.err (!%p1935_p4)
}
 0x5f5   : > { %s1939_s9 = scalar_lea.hbm %s2391_s17, 64  ;;  %s1943_s25 = scalar_lea.hbm %s2448_s8, 128 }
 0x5f6   : > { %p1940_p8 = scmp.ne.s32.totalorder %s2391_s17, %s1939_s9  ;;  %p1944_p0 = scmp.lt.s32.totalorder %s2391_s17, %s2448_s8 }
 0x5f7   : > { %p1945_p13 = scmp.lt.s32.totalorder %s1943_s25, %s1939_s9 }
 0x5f8   : > { %p1941_p6 = pnand %p1940_p8, %p2496_p12 }
 0x5f9   : > { %p1946_p9 = por %p1945_p13, %p1944_p0 }
 0x5fa   : > { %p1942_p3 = pneg %p1941_p6 }
 0x5fc   : > { %p1947_p11 = pnand %p1946_p9, %p1942_p3 }
 0x5fe   : > { %1950 = shalt.err (!%p1947_p11)
}
 0x5ff   : > { %1603 = dma.vmem_to_hbm [thread:$0]  (%p2496_p12), %s2393_s13, 64, %s2391_s17, %s1236_s30  }
 0x600 PF: > { %s2497_s1 = sld [smem:[#allocation24_spill]] }
 0x601   : > { %s2498_s14 = sld [smem:[#allocation29_spill]] }
 0x602   : > { %s2499_s10 = sld [smem:[#allocation26_spill]] }
 0x606   : > { %s1262_s3 = sand.u32 1, %s2497_s1  }
 0x607   : > { %p2500_p2 = scmp.ne.s32.totalorder %s2498_s14, 0  ;;  %s1263_s23 = scalar_lea.sflag [#allocation8], %s1262_s3 }
 0x608   : > { %p2501_p5 = scmp.ge.s32.totalorder %s2499_s10, 2 }
 0x60a   : > { %p1629_p10 = pnand %p2501_p5, %p2500_p2 }
 0x60c   : > { %p1630_p1 = pneg %p1629_p10 }
 0x60e   : > { %1992 = dma.done.wait (%p1630_p1), %s1263_s23, 64  }
 0x60f   : > { %1994 = vsyncadd (%p1630_p1), %s1263_s23, 4294967232  ;;  %s29_s10 = sadd.s32 1, %s2499_s10   ;;  %s2502_s21 = sld [smem:[#allocation28_spill]] }
 0x610   : > { %p26_p7 = scmp.ge.s32.totalorder %s29_s10, 4   ;;  %s2503_s30 = sld [smem:[#allocation25_spill]] }
 0x611   : > { %s2504_s9 = sld [smem:[#allocation27_spill]]  ;;  %s2505_s27 = smov %s2001_s28 }
 0x612   : > { %s2506_s28 = smov %s2005_s29  ;;  %28 = sbr.rel (!%p26_p7) target bundleno = 15 (0xf), region = 141 }
 0x615   : > { %s2507_s29 = smov %s2502_s21 }
 0x617   :  { %1268 = vsyncpa [#allocation7], 1 }
 0x618   :  { %1270 = vsyncpa [#allocation7 + $0x1], 1 }
 0x619   :  { %1271 = vsyncpa [#allocation10], 1 }
 0x61a   :  { %1273 = vsyncpa [#allocation10 + $0x1], 1 }
 0x61b   :  { %1274 = vsyncpa [#allocation13], 1 }
 0x61c   :  { %1275 = vsyncpa [#allocation16], 1 }
 0x61d   :  { %1276 = vsyncpa [#allocation8], 1 }
 0x61e   :  { %1278 = vsyncpa [#allocation8 + $0x1], 1 }

</bundles_post_ra>
